<compile_context>
chip_gen: v7x
topology: tpu7x:2x2x1
jax: 0.10.0
libtpu: 0.0.40
codegen_flags: <defaults>
</compile_context>

<pallas_src>
import jax
import jax.numpy as jnp
from jax.experimental import pallas as pl
from jax.experimental.pallas import tpu as pltpu


def _l2norm_kernel(x_ref, o_ref):
    # Block: (TN, C, TILE_HW). Reduction over the channel (sublane-side) axis.
    x = x_ref[...].astype(jnp.float32)                 # f32 throughout the math
    ssq = jnp.sum(x * x, axis=1, keepdims=True)        # (TN, 1, TILE_HW)
    inv_norm = jax.lax.rsqrt(ssq + 1e-6)               # EUP rsqrt (free-ish slot)
    o_ref[...] = (x * inv_norm).astype(o_ref.dtype)    # single downcast on store


def _round_up(x, m):
    return -(-x // m) * m


def _vmem_budget():
    """Generation-aware (vmem_limit_bytes, per-block byte budget)."""
    try:
        cap = pltpu.get_tpu_info().vmem_capacity_bytes
    except Exception:
        cap = 64 << 20  # conservative fallback (v7x-sized)
    if cap <= (64 << 20):
        # v7x-class: 64 MiB physical VMEM per TensorCore.
        return 48 << 20, 2 << 20
    # v5e / v6e: 128 MiB physical VMEM.
    return 64 << 20, 4 << 20


def _choose_tiles(N, C, HW_pad, itemsize, block_budget):
    """Pick (TN, TILE_HW).

    Budget arithmetic uses the sublane-padded channel count so the real VMEM
    footprint is what we think it is.  With `block_budget` B per block, the
    pipeline uses ~4B (in+out, double-buffered) plus ~3*(4/itemsize)*B of f32
    intermediates — comfortably inside the explicit vmem_limit_bytes above.
    """
    sub_pack = 8 * (4 // itemsize)              # 8 (f32), 16 (bf16)
    c_pad = _round_up(C, sub_pack)
    col_bytes = c_pad * itemsize                # one padded lane column
    slab = col_bytes * HW_pad                   # one padded (C, HW_pad) slice

    if slab <= block_budget:
        # Small feature map: full HW on lanes, batch several N per step.
        tn = max(1, min(N, block_budget // slab))
        tile_hw = HW_pad
    else:
        # Large feature map: one batch element per step, tile the lane axis
        # with a multiple of 128 (lane-dense, unmasked stores).
        tn = 1
        tile_hw = (block_budget // col_bytes) // 128 * 128
        tile_hw = max(128, min(tile_hw, HW_pad))

    def steps(tn_, thw_):
        return (-(-N // tn_)) * (-(-HW_pad // thw_))

    # Guarantee enough grid steps for pipelining + megacore sharding.
    MIN_STEPS = 4
    while steps(tn, tile_hw) < MIN_STEPS:
        if tn > 1:
            tn = -(-tn // 2)
        elif tile_hw >= 256:
            tile_hw = max(128, ((tile_hw // 128) // 2) * 128)
        else:
            break  # problem too small for more steps
    return tn, tile_hw


def feature_l2_norm(feature):
    """feature: (N, C, H, W) -> (N, C, H, W), L2-normalized over C."""
    N, C, H, W = feature.shape
    HW = H * W
    x = feature.reshape(N, C, HW)

    # Lane-dense layout: pad the HW (lane) axis to a multiple of 128.
    HW_pad = _round_up(HW, 128)
    if HW_pad != HW:
        x = jnp.pad(x, ((0, 0), (0, 0), (0, HW_pad - HW)))

    itemsize = jnp.dtype(feature.dtype).itemsize
    vmem_limit, block_budget = _vmem_budget()
    tn, tile_hw = _choose_tiles(N, C, HW_pad, itemsize, block_budget)

    grid = (pl.cdiv(N, tn), pl.cdiv(HW_pad, tile_hw))

    out = pl.pallas_call(
        _l2norm_kernel,
        out_shape=jax.ShapeDtypeStruct((N, C, HW_pad), feature.dtype),
        grid=grid,
        in_specs=[pl.BlockSpec((tn, C, tile_hw), lambda n, h: (n, 0, h))],
        out_specs=pl.BlockSpec((tn, C, tile_hw), lambda n, h: (n, 0, h)),
        compiler_params=pltpu.CompilerParams(
            dimension_semantics=("parallel", "parallel"),
            vmem_limit_bytes=vmem_limit,
        ),
    )(x)

    if HW_pad != HW:
        out = out[:, :, :HW]
    return out.reshape(N, C, H, W)


if __name__ == "__main__":
    key = jax.random.PRNGKey(0)
    k0, k1, k2 = jax.random.split(key, 3)

    # Small NCHW feature map: batch=2, channels=4, 16x16.
    x = jax.random.normal(k0, (2, 4, 16, 16), dtype=jnp.float32)
    y = jax.block_until_ready(feature_l2_norm(x))
    y_ref = x / jnp.sqrt(jnp.sum(x * x, axis=1, keepdims=True) + 1e-6)
    assert y.shape == x.shape
    assert jnp.allclose(y, y_ref, atol=1e-5, rtol=1e-5)

    # Non-128-multiple spatial map (7x7) — exercises the lane-padding path.
    x_odd = jax.random.normal(k1, (2, 4, 7, 7), dtype=jnp.float32)
    y_odd = jax.block_until_ready(feature_l2_norm(x_odd))
    ref_odd = x_odd / jnp.sqrt(jnp.sum(x_odd * x_odd, axis=1, keepdims=True) + 1e-6)
    assert y_odd.shape == x_odd.shape
    assert jnp.allclose(y_odd, ref_odd, atol=1e-5, rtol=1e-5)

    # Larger bf16 map — exercises the HW-tiled path and f32 accumulation.
    x_big = jax.random.normal(k2, (1, 64, 64, 80), dtype=jnp.bfloat16)
    y_big = jax.block_until_ready(feature_l2_norm(x_big))
    xb32 = x_big.astype(jnp.float32)
    ref_big = xb32 / jnp.sqrt(jnp.sum(xb32 * xb32, axis=1, keepdims=True) + 1e-6)
    assert y_big.shape == x_big.shape
    assert jnp.allclose(y_big.astype(jnp.float32), ref_big, atol=2e-2, rtol=2e-2)

    print("KERNEL_OK")
</pallas_src>

<mosaic_0001>
module attributes {stable_mosaic.version = 11 : i64} {
  func.func @_l2norm_kernel(%arg0: i32, %arg1: i32, %arg2: memref<1x4x128xf32, #tpu.memory_space<vmem>>, %arg3: memref<1x4x128xf32, #tpu.memory_space<vmem>>) attributes {dimension_semantics = [#tpu.dimension_semantics<parallel>, #tpu.dimension_semantics<parallel>], iteration_bounds = array<i64: 2, 2>, scalar_prefetch = 0 : i64, scratch_operands = 0 : i64, tpu.core_type = #tpu.core_type<tc>, window_params = [{transform_indices = @transform_0, window_bounds = array<i64: 1, 4, 128>}, {transform_indices = @transform_1, window_bounds = array<i64: 1, 4, 128>}]} {
    %c0 = arith.constant 0 : index
    %c0_0 = arith.constant 0 : index
    %c0_1 = arith.constant 0 : index
    %0 = vector.load %arg2[%c0, %c0_0, %c0_1] : memref<1x4x128xf32, #tpu.memory_space<vmem>>, vector<1x4x128xf32>
    %1 = arith.mulf %0, %0 : vector<1x4x128xf32>
    %cst = arith.constant dense<0.000000e+00> : vector<1x128xf32>
    %2 = vector.multi_reduction <add>, %1, %cst [1] : vector<1x4x128xf32> to vector<1x128xf32>
    %3 = vector.shape_cast %2 : vector<1x128xf32> to vector<1x1x128xf32>
    %cst_2 = arith.constant 9.99999997E-7 : f32
    %4 = vector.broadcast %cst_2 : f32 to vector<1x1x128xf32>
    %5 = arith.addf %3, %4 : vector<1x1x128xf32>
    %6 = math.rsqrt %5 : vector<1x1x128xf32>
    %7 = vector.broadcast %6 : vector<1x1x128xf32> to vector<1x4x128xf32>
    %8 = arith.mulf %0, %7 : vector<1x4x128xf32>
    %c0_3 = arith.constant 0 : index
    %c0_4 = arith.constant 0 : index
    %c0_5 = arith.constant 0 : index
    %9 = vector.load %arg3[%c0_3, %c0_4, %c0_5] : memref<1x4x128xf32, #tpu.memory_space<vmem>>, vector<1x4x128xf32>
    tpu.vector_store %arg3[%c0_3, %c0_4, %c0_5], %8 {strides = array<i32>} : memref<1x4x128xf32, #tpu.memory_space<vmem>>, vector<1x4x128xf32>,
    return
  }
  func.func @transform_0(%arg0: i32, %arg1: i32) -> (i32, i32, i32) {
    %c0_i32 = arith.constant 0 : i32
    %c0_i32_0 = arith.constant 0 : i32
    return %arg0, %c0_i32, %arg1 : i32, i32, i32
  }
  func.func @transform_1(%arg0: i32, %arg1: i32) -> (i32, i32, i32) {
    %c0_i32 = arith.constant 0 : i32
    %c0_i32_0 = arith.constant 0 : i32
    return %arg0, %c0_i32, %arg1 : i32, i32, i32
  }
}

</mosaic_0001>

<bundles_post_ra>
// kernel: tpu_custom_call.1
= control target key start
LH: loop header
LB: loop body
LE: loop exit
PB: predicated region body
PF: predicated region fallthrough
CT: control target
= control target key end

     0   :  { %6 = vsyncpa [#allocation3], 0  ;;  %s696_s0 = inlined_call_operand.hbm [shape: f32[2,4,256], index: 0, kind: input, shape index: {}]   ;;  %s697_s1 = inlined_call_operand.hbm [shape: f32[2,4,256], index: 1, kind: output, shape index: {}]  }
   0x1   :  { %8 = vsyncpa [#allocation3 + $0x1], 0 }
   0x2   :  { %9 = vsyncpa [#allocation4], 0 }
   0x3   :  { %11 = vsyncpa [#allocation4 + $0x1], 0  ;;  %s502_s6 = smov 0   ;;  %s504_s7 = smov 0  }
   0x4   :  { %s506_s8 = smov 0   ;;  %s508_s9 = smov 0  }
   0x5   :  { %s510_s10 = smov 0   ;;  %s512_s11 = smov 0  }
   0x6   :  { %s514_s12 = smov 0   ;;  %s516_s13 = smov 0  }
   0x7 LB: > { %s265_s14 = sadd.s32 4294967295, %s488_s13   ;;  %s266_s15 = sadd.s32 4294967294, %s488_s13   ;;  %s488_s13 = sphi %s516_s13, %s17_s13   ;;  %s484_s12 = sphi %s514_s12, %s714_s12   ;;  %s480_s11 = sphi %s512_s11, %s713_s11   ;;  %s476_s10 = sphi %s510_s10, %s712_s10   ;;  %s472_s9 = sphi %s508_s9, %s711_s9   ;;  %s468_s8 = sphi %s506_s8, %s710_s8   ;;  %s464_s7 = sphi %s504_s7, %s709_s7   ;;  %s460_s6 = sphi %s502_s6, %s708_s6  }
   0x8   : > { %s26_s16 = sadd.s32 1, %s480_s11  ;;  %s29_s17 = sadd.s32 1, %s484_s12 }
   0x9   : > { %p27_p0 = scmp.ge.s32.totalorder %s26_s16, 2  ;;  %s38_s18 = sadd.s32 1, %s468_s8 }
   0xa   : > { %p45_p1 = scmp.ne.s32.totalorder %s468_s8, %s464_s7  ;;  %p46_p2 = scmp.eq.s32.totalorder %s488_s13, 0 }
   0xb   : > { %s716_s16 = smov (%p27_p0, %s26_s16), 0  ;;  %s718_s17 = smov (!%p27_p0, %s29_s17), %s484_s12 }
   0xc   : > { %s34_s19 = ssub.s32 %s480_s11, %s716_s16  ;;  %p555_p3 = por %p46_p2, %p45_p1 }
   0xd   : > { %p31_p4 = scmp.ge.s32.totalorder %s718_s17, 2  ;;  %p51_p5 = scmp.ne.s32.totalorder %s464_s7, %s460_s6 }
   0xe   : > { %p52_p6 = scmp.eq.s32.totalorder %s265_s14, 0  ;;  %p77_p7 = scmp.eq.s32.totalorder %s265_s14, 3 }
   0xf   : > { %s720_s17 = smov (%p31_p4, %s718_s17), 0  ;;  %p83_p10 = scmp.eq.s32.totalorder %s266_s15, 3 }
  0x10   : > { %p563_p8 = por %p52_p6, %p51_p5  ;;  %p567_p9 = por %p77_p7, %p45_p1 }
  0x11   : > { %s33_s23 = ssub.s32 %s484_s12, %s720_s17  ;;  %p573_p12 = por %p83_p10, %p51_p5 }
  0x12   : > { %s701_s22 = scalar_select %p567_p9, 1, 0 }
  0x13   : > { %s35_s24 = sor.u32 %s34_s19, %s33_s23  ;;  %p292_p13 = scmp.lt.s32.totalorder %s488_s13, 4 }
  0x14   : > { %p36_p11 = scmp.eq.s32.totalorder %s35_s24, 0  ;;  %s103_s26 = sand.u32 1, %s468_s8  }
  0x15   : > { %s702_s25 = scalar_select %p573_p12, 1, 0 }
  0x16   : > { %s580_s27 = scalar_select %p36_p11, %s468_s8, %s38_s18  }
  0x17   : > { %s269_s28 = sshll.u32 %s103_s26, 2  ;;  %s270_s29 = sshll.u32 %s484_s12, 1 }
  0x18   : > { %s112_s30 = sadd.s32 %s480_s11, %s270_s29  ;;  %s107_s2 = scalar_lea.vmem [#allocation2], %s269_s28 }
  0x19   : > { %s116_s3 = sshll.u32 %s107_s2, 4  ;;  %s271_s4 = sshll.u32 %s112_s30, 6  ;;  %s584_s3 = int_to_ptr.vmem [resolvable:$true] %s116_s3 }
  0x1a   : > { %s589_s15 = scalar_lea.hbm %s696_s0, %s271_s4  ;;  %p593_p0 = pnand %p292_p13, %p555_p3 }
  0x1b   : > { %s104_s19 = scalar_lea.sflag [#allocation3], %s103_s26  ;;  %s360_s23 = scalar_lea.hbm %s589_s15, 64 }
  0x1c   : > { %p361_p4 = scmp.ne.s32.totalorder %s589_s15, %s360_s23  ;;  %p362_p5 = pneg %p593_p0 }
  0x1d   : > { %s365_s28 = scalar_lea.hbm %s696_s0, 256  ;;  %p366_p3 = scmp.lt.u32.totalorder %s589_s15, %s696_s0 }
  0x1e   : > { %p363_p6 = pnand %p362_p5, %p361_p4  ;;  %p367_p10 = scmp.lt.u32.totalorder %s365_s28, %s360_s23 }
  0x1f   : > { %p369_p13 = scmp.lt.u32.totalorder %s360_s23, %s589_s15 }
  0x20   : > { %p364_p7 = pneg %p363_p6  ;;  %p368_p11 = por %p367_p10, %p366_p3 }
  0x22   : > { %p370_p1 = por %p369_p13, %p368_p11 }
  0x24   : > { %p371_p2 = pnand %p370_p1, %p364_p7 }
  0x26   : > { %374 = shalt.err (!%p371_p2)
}
  0x27   : > { %s375_s26 = scalar_lea.vmem %s584_s3, 64  ;;  %s490_s2 = smov [#allocation2]  }
  0x28   : > { %p376_p4 = scmp.ne.s32.totalorder %s584_s3, %s375_s26  ;;  %s380_s4 = sshll.u32 %s490_s2, 4  ;;  %s381_s4 = int_to_ptr.vmem [resolvable:$false] %s380_s4 }
  0x29   : > { %s382_s5 = scalar_lea.vmem %s381_s4, 128  ;;  %p383_p9 = scmp.lt.s32.totalorder %s584_s3, %s381_s4 }
  0x2a   : > { %p378_p6 = pnand %p376_p4, %p362_p5  ;;  %p384_p3 = scmp.lt.s32.totalorder %s382_s5, %s375_s26 }
  0x2c   : > { %p379_p12 = pneg %p378_p6  ;;  %p385_p10 = por %p384_p3, %p383_p9 }
  0x2e   : > { %p386_p11 = pnand %p385_p10, %p379_p12 }
  0x30   : > { %389 = shalt.err (!%p386_p11)
}
  0x31   : > { %287 = dma.hbm_to_vmem [thread:$0]  (!%p593_p0), %s589_s15, 64, %s584_s3, %s104_s19  }
  0x32   : > { %p704_p1 = scmp.lt.s32.totalorder %s488_s13, 5  ;;  %p705_p2 = scmp.ge.s32.totalorder %s488_s13, 1 }
  0x34   : > { %p122_p5 = pnand %p705_p2, %p704_p1 }
  0x35   : > { %s629_s14 = sand.u32 (!%p122_p5), 1, %s464_s7  }
  0x36   : > { %125 = sbr.rel (%p122_p5) target bundleno = 107 (0x6b), region = 24  ;;  %s273_s23 = sshll.u32 (!%p122_p5), %s629_s14, 2 }
  0x37   : > { %s128_s20 = scalar_lea.sflag (!%p122_p5), [#allocation3], %s629_s14  ;;  %s131_s24 = scalar_lea.vmem (!%p122_p5), [#allocation2], %s273_s23 }
  0x3d   : > { %451 = dma.done.wait (%p563_p8), %s128_s20, 64  }
  0x3e   : > { %453 = vsyncadd (%p563_p8), %s128_s20, 4294967232  ;;  %v150_v0 = vld [vmem:[%s131_s24] sm:$0xf]  ;;  %vm152_vm0 = vcmask 1043456   ;;  %s276_s3 = sshll.u32 %s476_s10, 1  ;;  %s149_s21 = scalar_lea.vmem [#allocation5], %s273_s23 }
  0x3f   : > { %v151_v1 = vmul.f32 %v150_v0, %v150_v0  ;;  %s176_s15 = sadd.s32 %s472_s9, %s276_s3  ;;  %s180_s18 = sshll.u32 %s149_s21, 4  ;;  %s639_s18 = int_to_ptr.vmem [resolvable:$true] %s180_s18 }
  0x40   : > { %s277_s19 = sshll.u32 %s176_s15, 6  ;;  %s165_s26 = scalar_lea.sflag [#allocation4], %s629_s14 }
  0x41   : > { %v153_v2 = vsel %vm152_vm0, %v151_v1, 0.0  ;;  %s644_s30 = scalar_lea.hbm %s697_s1, %s277_s19  ;;  %s390_s2 = scalar_lea.vmem %s639_s18, 64 }
  0x42   : > { %v154_v3 = vrot.slane %v153_v2, 4  ;;  %p391_p8 = scmp.ne.s32.totalorder %s639_s18, %s390_s2  ;;  %p706_p9 = scmp.ne.s32.totalorder %s701_s22, 0 }
  0x43   : > { %s491_s9 = smov [#allocation5]  }
  0x44   : > { %v155_v4 = vadd.f32 %v154_v3, %v153_v2  ;;  %p392_p12 = pnand %p391_p8, %p706_p9  ;;  %s394_s10 = sshll.u32 %s491_s9, 4  ;;  %s395_s10 = int_to_ptr.vmem [resolvable:$false] %s394_s10 }
  0x45   : > { %s396_s4 = scalar_lea.vmem %s395_s10, 128  ;;  %p397_p7 = scmp.lt.s32.totalorder %s639_s18, %s395_s10 }
  0x46   : > { %v156_v5 = vrot.slane %v155_v4, 2  ;;  %p393_p0 = pneg %p392_p12  ;;  %p398_p13 = scmp.lt.s32.totalorder %s396_s4, %s390_s2 }
  0x48   : > { %v157_v6 = vadd.f32 %v156_v5, %v155_v4  ;;  %p399_p4 = por %p398_p13, %p397_p7 }
  0x4a   : > { %v158_v7 = vrot.slane %v157_v6, 1  ;;  %p400_p6 = pnand %p399_p4, %p393_p0 }
  0x4c   : > { %v159_v8 = vadd.f32 %v158_v7, %v157_v6 }
  0x4e   : > { %v160_v9 = vadd.f32 1e-06, %v159_v8 }
  0x50   : > { %358 = vrsqrt.f32 %v160_v9 }
  0x5a   : > { %v359_v10 = vpop.eup %358 }
  0x5b   : > { %v162_v11 = vmul.f32 %v359_v10, %v150_v0 }
  0x5d   : > { %163 = vst [vmem:[%s149_s21] sm:$0xf] %v162_v11 }
  0x5e   : > { %403 = shalt.err (!%p400_p6)
}
  0x5f   : > { %s404_s5 = scalar_lea.hbm %s644_s30, 64  ;;  %s408_s20 = scalar_lea.hbm %s697_s1, 256 }
  0x60   : > { %p405_p3 = scmp.ne.s32.totalorder %s644_s30, %s404_s5  ;;  %p409_p1 = scmp.lt.u32.totalorder %s644_s30, %s697_s1 }
  0x61   : > { %p410_p2 = scmp.lt.u32.totalorder %s408_s20, %s404_s5  ;;  %p412_p8 = scmp.lt.u32.totalorder %s404_s5, %s644_s30 }
  0x62   : > { %p406_p10 = pnand %p405_p3, %p706_p9 }
  0x63   : > { %p411_p5 = por %p410_p2, %p409_p1 }
  0x64   : > { %p407_p11 = pneg %p406_p10 }
  0x65   : > { %p413_p12 = por %p412_p8, %p411_p5 }
  0x67   : > { %p414_p0 = pnand %p413_p12, %p407_p11 }
  0x69   : > { %417 = shalt.err (!%p414_p0)
}
  0x6a   : > { %282 = dma.vmem_to_hbm [thread:$0]  (%p706_p9), %s639_s18, 64, %s644_s30, %s165_s26  }
  0x6b PF: > { %p293_p7 = scmp.ge.s32.totalorder %s488_s13, 2  ;;  %s192_s15 = sand.u32 1, %s460_s6  }
  0x6c   : > { %p707_p13 = scmp.ne.s32.totalorder %s702_s25, 0  ;;  %s193_s21 = scalar_lea.sflag [#allocation4], %s192_s15 }
  0x6e   : > { %p289_p4 = pnand %p293_p7, %p707_p13 }
  0x70   : > { %455 = dma.done.wait (!%p289_p4), %s193_s21, 64  }
  0x71   : > { %457 = vsyncadd (!%p289_p4), %s193_s21, 4294967232  ;;  %s17_s13 = sadd.s32 1, %s488_s13   ;;  %s708_s6 = smov %s464_s7 }
  0x72   : > { %p14_p6 = scmp.ge.s32.totalorder %s17_s13, 6   ;;  %s709_s7 = smov %s468_s8 }
  0x73   : > { %s710_s8 = smov %s580_s27  ;;  %s711_s9 = smov %s480_s11 }
  0x74   : > { %s712_s10 = smov %s484_s12  ;;  %s713_s11 = smov %s716_s16 }
  0x75   : > { %s714_s12 = smov %s720_s17  ;;  %16 = sbr.rel (!%p14_p6) target bundleno = 7 (0x7), region = 69 }
  0x7c   :  { %198 = vsyncpa [#allocation3], 1 }
  0x7d   :  { %200 = vsyncpa [#allocation3 + $0x1], 1 }
  0x7e   :  { %201 = vsyncpa [#allocation4], 1 }
  0x7f   :  { %203 = vsyncpa [#allocation4 + $0x1], 1 }

</bundles_post_ra>
